<compile_context>
chip_gen: v6e
topology: v6e:2x2x1
jax: 0.10.0
libtpu: 0.0.40
codegen_flags: <defaults>
</compile_context>

<pallas_src>
import functools

import jax
import jax.numpy as jnp
from jax.experimental import pallas as pl
from jax.experimental.pallas import tpu as pltpu


def af_block_kernel(x_ref, snr_ref, w1t_ref, b1_ref, w2t_ref, b2_ref, out_ref,
                    m_scratch, g_scratch, *, bt, c, hw):
    """One grid step: `bt` batch elements x all C channels x full H*W lane dim.

    x_ref:     (bt*C, HW)  activations, native dtype (lane-dense spatial dim)
    snr_ref:   (B, 1)      f32, resident across the grid; sliced per batch row
    w1t_ref:   (Nh, C+1)   fc1 weight, transposed (f32)
    b1_ref:    (Nh, 1)     fc1 bias column (f32)
    w2t_ref:   (No, Nh)    fc2 weight, transposed (f32)
    b2_ref:    (No, 1)     fc2 bias column (f32)
    out_ref:   (bt*C, HW)  gated activations, native dtype
    m_scratch: (C+1, bt)   f32 scratch holding the fc1 input [mu ; snr] columns
    g_scratch: (C,  bt)    f32 scratch holding the sigmoid gate columns
    """
    base = pl.program_id(0) * bt
    inv_hw = jnp.float32(1.0 / hw)

    # ---- Build the fc1 input matrix column-by-column in VMEM scratch --------
    # Column j = [spatial means of the C channels of local batch j ; SNR_j].
    # The store/load through scratch performs the tiny sublane<->lane relayout
    # with plain ref slices only (no reshape / transpose / concat needed).
    for j in range(bt):
        rows = pl.ds(j * c, c)
        mu_j = jnp.sum(x_ref[rows, :].astype(jnp.float32), axis=-1,
                       keepdims=True) * inv_hw                      # (C, 1) f32
        m_scratch[pl.ds(0, c), pl.ds(j, 1)] = mu_j
        m_scratch[pl.ds(c, 1), pl.ds(j, 1)] = snr_ref[pl.ds(base + j, 1), :]

    # ---- fc1 + ReLU, fc2 + Sigmoid: one MXU pass per layer per grid step ----
    # Weights stay on the streaming side once; the batch rides the lane dim.
    m = m_scratch[...]                                              # (C+1, bt)
    h = jnp.dot(w1t_ref[...], m, preferred_element_type=jnp.float32)
    h = jnp.maximum(h + b1_ref[...], 0.0)                           # (Nh, bt)
    s = jnp.dot(w2t_ref[...], h, preferred_element_type=jnp.float32)
    g_scratch[...] = jax.nn.sigmoid(s + b2_ref[...])                # (C,  bt)

    # ---- Channel-wise gate, streamed from the ref in the native dtype -------
    # (gate is cast to the input dtype so bf16 inputs stay packed on the VPU).
    for j in range(bt):
        rows = pl.ds(j * c, c)
        gate_j = g_scratch[pl.ds(0, c), pl.ds(j, 1)]                # (C, 1) f32
        out_ref[rows, :] = x_ref[rows, :] * gate_j.astype(out_ref.dtype)


def prepare_af_params(w1, b1, w2, b2):
    """One-time parameter prep (hoisted out of the per-step forward).

    w1: (C+1, Nh), b1: (Nh,), w2: (Nh, No), b2: (No,)  ->  transposed f32 forms
    so the kernel's batch dimension rides the lane dim of both matmuls.
    """
    w1t = jnp.asarray(w1, jnp.float32).T            # (Nh, C+1)
    b1c = jnp.asarray(b1, jnp.float32).reshape(-1, 1)
    w2t = jnp.asarray(w2, jnp.float32).T            # (No, Nh)
    b2c = jnp.asarray(b2, jnp.float32).reshape(-1, 1)
    return w1t, b1c, w2t, b2c


def _tensorcores_per_chip():
    """Best-effort TensorCore count per chip (megacore parts have 2)."""
    try:
        kind = jax.devices()[0].device_kind.lower()
    except Exception:
        return 1
    if "lite" in kind or "v5e" in kind or "v6e" in kind:
        return 1            # v5e / v6e: single TensorCore
    if "v4" in kind or "v5" in kind or "v7" in kind:
        return 2            # v4 / v5p / v7x: 2 TensorCores per chip
    return 1


def _pick_block_b(B, C, HW, itemsize, n_tc):
    """Batch rows per grid step from a conservative VMEM budget."""
    row_bytes = C * HW * itemsize
    budget = 2 * 1024 * 1024            # per-block x bytes; ~4-5x this (double-
                                        # buffered in+out, optional 3-deep input)
                                        # fits every generation's default scoped VMEM
    bt = max(1, min(B, budget // max(1, row_bytes)))
    if n_tc > 1 and B >= 2:
        # Megacore only: keep >= 2 grid steps per TensorCore when batch allows,
        # so both cores get work and each still pipelines its DMAs.
        bt = min(bt, max(1, B // min(B, 2 * n_tc)))
    # Legalize: bt must divide B, and (bt*C) must be sublane-aligned unless the
    # block covers the whole batch (the (8,128) BlockSpec rule on the data path).
    for cand in range(bt, 0, -1):
        if B % cand == 0 and (cand == B or (cand * C) % 8 == 0):
            return cand
    return B


def af_block(x, snr, params, *, block_b=None):
    """AF_block forward (Pallas TPU).

    x:      (B, C, H, W) activations (any float dtype)
    snr:    (B, 1) per-example SNR
    params: output of prepare_af_params(w1, b1, w2, b2)
    """
    w1t, b1c, w2t, b2c = params
    B, C, H, W = x.shape
    HW = H * W
    Nh, Cp1 = w1t.shape
    No = w2t.shape[0]
    assert Cp1 == C + 1, "fc1 expects C+1 input features (channel means + SNR)"
    assert No == C, "AF_block output gate width must equal channel count"
    # Lane-dense whenever HW % 128 == 0 (e.g. 16x16=256).  Smaller feature maps
    # (e.g. 8x8=64) remain correct but fall back to masked partial stores.

    # Lane-dense, sublane-packed view of x (free row-major reshape).
    x2 = x.reshape(B * C, HW)
    snr_col = snr.reshape(B, 1).astype(jnp.float32)

    if block_b is None:
        block_b = _pick_block_b(B, C, HW, x.dtype.itemsize, _tensorcores_per_chip())
    assert B % block_b == 0
    assert block_b == B or (block_b * C) % 8 == 0, "block rows must be sublane-aligned"
    steps = B // block_b
    n_blk = block_b * C

    blk_bytes = n_blk * HW * x.dtype.itemsize
    param_bytes = sum(int(a.size) * 4 for a in (snr_col, w1t, b1c, w2t, b2c))

    # Deeper input buffering only when there are enough steps to pipeline and the
    # extra buffer still fits comfortably under the default scoped-VMEM limits.
    x_spec_kwargs = {}
    if steps >= 3 and 5 * blk_bytes + param_bytes <= 12 * 1024 * 1024:
        x_spec_kwargs["pipeline_mode"] = pl.Buffered(3)
    x_spec = pl.BlockSpec((n_blk, HW), lambda i: (i, 0), **x_spec_kwargs)

    cost = pl.CostEstimate(
        flops=int(2 * B * C * HW                                  # reduce + gate mul
                  + 2 * B * (C + 1) * Nh + 2 * B * Nh * No),      # the two fc layers
        transcendentals=int(B * No),                              # sigmoid
        bytes_accessed=int(2 * x2.size * x.dtype.itemsize + param_bytes),
    )

    kernel = functools.partial(af_block_kernel, bt=block_b, c=C, hw=HW)

    out2 = pl.pallas_call(
        kernel,
        out_shape=jax.ShapeDtypeStruct((B * C, HW), x.dtype),
        grid_spec=pltpu.PrefetchScalarGridSpec(
            num_scalar_prefetch=0,
            grid=(steps,),
            in_specs=[
                x_spec,                                       # x, lane-dense data path
                pl.BlockSpec((B, 1), lambda i: (0, 0)),       # snr (tiny, resident)
                pl.BlockSpec((Nh, Cp1), lambda i: (0, 0)),    # fc1 weight^T (resident)
                pl.BlockSpec((Nh, 1), lambda i: (0, 0)),      # fc1 bias column
                pl.BlockSpec((No, Nh), lambda i: (0, 0)),     # fc2 weight^T (resident)
                pl.BlockSpec((No, 1), lambda i: (0, 0)),      # fc2 bias column
            ],
            out_specs=pl.BlockSpec((n_blk, HW), lambda i: (i, 0)),
            scratch_shapes=[
                pltpu.VMEM((C + 1, block_b), jnp.float32),    # fc1 input columns
                pltpu.VMEM((C, block_b), jnp.float32),        # gate columns
            ],
        ),
        compiler_params=pltpu.CompilerParams(
            dimension_semantics=("parallel",)),
        cost_estimate=cost,
    )(x2, snr_col, w1t, b1c, w2t, b2c)

    return out2.reshape(B, C, H, W)


def af_block_ref(x, snr, w1, b1, w2, b2):
    """Pure-JAX reference mirroring the PyTorch AF_block forward exactly."""
    mu = jnp.mean(x, axis=(2, 3))                 # (B, C)
    out = jnp.concatenate([mu, snr], axis=1)      # (B, C+1)
    out = jnp.maximum(out @ w1 + b1, 0.0)         # fc1 + ReLU
    out = jax.nn.sigmoid(out @ w2 + b2)           # fc2 + Sigmoid
    return out[:, :, None, None] * x              # unsqueeze(2).unsqueeze(3) * x


if __name__ == "__main__":
    # Small shapes implied by the forward: Nin = No = C (channel gate), Nh hidden.
    B, C, H, W = 2, 4, 16, 16
    Nin, Nh, No = C, 32, C

    key = jax.random.PRNGKey(0)
    kx, ksnr, kw1, kb1, kw2, kb2 = jax.random.split(key, 6)

    x = jax.random.normal(kx, (B, C, H, W), dtype=jnp.float32)
    snr = jax.random.uniform(ksnr, (B, 1), dtype=jnp.float32) * 20.0

    # PyTorch-Linear-equivalent parameters, stored as (in_features, out_features).
    w1 = jax.random.normal(kw1, (Nin + 1, Nh), dtype=jnp.float32) * 0.1
    b1 = jax.random.normal(kb1, (Nh,), dtype=jnp.float32) * 0.1
    w2 = jax.random.normal(kw2, (Nh, No), dtype=jnp.float32) * 0.1
    b2 = jax.random.normal(kb2, (No,), dtype=jnp.float32) * 0.1

    params = prepare_af_params(w1, b1, w2, b2)      # one-time, hoisted prep

    out = jax.block_until_ready(af_block(x, snr, params))
    ref = af_block_ref(x, snr, w1, b1, w2, b2)

    assert out.shape == (B, C, H, W)
    # Tolerance covers possible MXU-precision differences between the in-kernel
    # dots and the XLA reference dots; structural/indexing bugs would be >> 1e-2.
    assert jnp.allclose(out, ref, atol=1e-2, rtol=1e-2), "mismatch vs JAX reference"

    print("KERNEL_OK")
</pallas_src>

<mosaic_0001>
module attributes {stable_mosaic.version = 11 : i64} {
  func.func @af_block_kernel(%arg0: i32, %arg1: memref<8x256xf32, #tpu.memory_space<vmem>>, %arg2: memref<2x1xf32, #tpu.memory_space<vmem>>, %arg3: memref<32x5xf32, #tpu.memory_space<vmem>>, %arg4: memref<32x1xf32, #tpu.memory_space<vmem>>, %arg5: memref<4x32xf32, #tpu.memory_space<vmem>>, %arg6: memref<4x1xf32, #tpu.memory_space<vmem>>, %arg7: memref<8x256xf32, #tpu.memory_space<vmem>>, %arg8: memref<5x2xf32, #tpu.memory_space<vmem>>, %arg9: memref<4x2xf32, #tpu.memory_space<vmem>>) attributes {dimension_semantics = [#tpu.dimension_semantics<parallel>], iteration_bounds = array<i64: 1>, scalar_prefetch = 0 : i64, scratch_operands = 2 : i64, tpu.core_type = #tpu.core_type<tc>, window_params = [{transform_indices = @transform_0, window_bounds = array<i64: 8, 256>}, {pipeline_mode = #tpu.pipeline_mode<synchronous>, transform_indices = @transform_1, window_bounds = array<i64: 2, 1>}, {pipeline_mode = #tpu.pipeline_mode<synchronous>, transform_indices = @transform_2, window_bounds = array<i64: 32, 5>}, {pipeline_mode = #tpu.pipeline_mode<synchronous>, transform_indices = @transform_3, window_bounds = array<i64: 32, 1>}, {pipeline_mode = #tpu.pipeline_mode<synchronous>, transform_indices = @transform_4, window_bounds = array<i64: 4, 32>}, {pipeline_mode = #tpu.pipeline_mode<synchronous>, transform_indices = @transform_5, window_bounds = array<i64: 4, 1>}, {transform_indices = @transform_6, window_bounds = array<i64: 8, 256>}]} {
    %c2_i32 = arith.constant 2 : i32
    %0 = arith.muli %arg0, %c2_i32 : i32
    %c0 = arith.constant 0 : index
    %c0_0 = arith.constant 0 : index
    %1 = vector.load %arg1[%c0, %c0_0] : memref<8x256xf32, #tpu.memory_space<vmem>>, vector<4x256xf32>
    %cst = arith.constant dense<0.000000e+00> : vector<4xf32>
    %2 = vector.multi_reduction <add>, %1, %cst [1] : vector<4x256xf32> to vector<4xf32>
    %3 = vector.shape_cast %2 : vector<4xf32> to vector<4x1xf32>
    %cst_1 = arith.constant 3.906250e-03 : f32
    %4 = vector.broadcast %cst_1 : f32 to vector<4x1xf32>
    %5 = arith.mulf %3, %4 : vector<4x1xf32>
    %c0_2 = arith.constant 0 : index
    %c0_3 = arith.constant 0 : index
    %6 = vector.load %arg8[%c0_2, %c0_3] : memref<5x2xf32, #tpu.memory_space<vmem>>, vector<4x1xf32>
    tpu.vector_store %arg8[%c0_2, %c0_3], %5 {strides = array<i32>} : memref<5x2xf32, #tpu.memory_space<vmem>>, vector<4x1xf32>,
    %c0_i32 = arith.constant 0 : i32
    %7 = arith.addi %0, %c0_i32 : i32
    %8 = arith.index_cast %7 : i32 to index
    %c0_4 = arith.constant 0 : index
    %9 = vector.load %arg2[%8, %c0_4] : memref<2x1xf32, #tpu.memory_space<vmem>>, vector<1x1xf32>
    %c4 = arith.constant 4 : index
    %c0_5 = arith.constant 0 : index
    %10 = vector.load %arg8[%c4, %c0_5] : memref<5x2xf32, #tpu.memory_space<vmem>>, vector<1x1xf32>
    tpu.vector_store %arg8[%c4, %c0_5], %9 {strides = array<i32>} : memref<5x2xf32, #tpu.memory_space<vmem>>, vector<1x1xf32>,
    %c4_6 = arith.constant 4 : index
    %c0_7 = arith.constant 0 : index
    %11 = vector.load %arg1[%c4_6, %c0_7] : memref<8x256xf32, #tpu.memory_space<vmem>>, vector<4x256xf32>
    %cst_8 = arith.constant dense<0.000000e+00> : vector<4xf32>
    %12 = vector.multi_reduction <add>, %11, %cst_8 [1] : vector<4x256xf32> to vector<4xf32>
    %13 = vector.shape_cast %12 : vector<4xf32> to vector<4x1xf32>
    %cst_9 = arith.constant 3.906250e-03 : f32
    %14 = vector.broadcast %cst_9 : f32 to vector<4x1xf32>
    %15 = arith.mulf %13, %14 : vector<4x1xf32>
    %c0_10 = arith.constant 0 : index
    %c1 = arith.constant 1 : index
    %16 = vector.load %arg8[%c0_10, %c1] : memref<5x2xf32, #tpu.memory_space<vmem>>, vector<4x1xf32>
    tpu.vector_store %arg8[%c0_10, %c1], %15 {strides = array<i32>} : memref<5x2xf32, #tpu.memory_space<vmem>>, vector<4x1xf32>,
    %c1_i32 = arith.constant 1 : i32
    %17 = arith.addi %0, %c1_i32 : i32
    %18 = arith.index_cast %17 : i32 to index
    %c0_11 = arith.constant 0 : index
    %19 = vector.load %arg2[%18, %c0_11] : memref<2x1xf32, #tpu.memory_space<vmem>>, vector<1x1xf32>
    %c4_12 = arith.constant 4 : index
    %c1_13 = arith.constant 1 : index
    %20 = vector.load %arg8[%c4_12, %c1_13] : memref<5x2xf32, #tpu.memory_space<vmem>>, vector<1x1xf32>
    tpu.vector_store %arg8[%c4_12, %c1_13], %19 {strides = array<i32>} : memref<5x2xf32, #tpu.memory_space<vmem>>, vector<1x1xf32>,
    %c0_14 = arith.constant 0 : index
    %c0_15 = arith.constant 0 : index
    %21 = vector.load %arg8[%c0_14, %c0_15] : memref<5x2xf32, #tpu.memory_space<vmem>>, vector<5x2xf32>
    %c0_16 = arith.constant 0 : index
    %c0_17 = arith.constant 0 : index
    %22 = vector.load %arg3[%c0_16, %c0_17] : memref<32x5xf32, #tpu.memory_space<vmem>>, vector<32x5xf32>
    %cst_18 = arith.constant dense<0.000000e+00> : vector<32x2xf32>
    %23 = tpu.matmul %22, %21, %cst_18 {dimension_numbers = #tpu.dot_dimension_numbers<[1], [0], [0], [1], [0, 0, 1, 1], [], []>} : vector<32x5xf32>, vector<5x2xf32>, vector<32x2xf32> -> vector<32x2xf32>
    %c0_19 = arith.constant 0 : index
    %c0_20 = arith.constant 0 : index
    %24 = vector.load %arg4[%c0_19, %c0_20] : memref<32x1xf32, #tpu.memory_space<vmem>>, vector<32x1xf32>
    %25 = vector.broadcast %24 : vector<32x1xf32> to vector<32x2xf32>
    %26 = arith.addf %23, %25 : vector<32x2xf32>
    %cst_21 = arith.constant 0.000000e+00 : f32
    %27 = vector.broadcast %cst_21 : f32 to vector<32x2xf32>
    %28 = arith.maximumf %26, %27 : vector<32x2xf32>
    %c0_22 = arith.constant 0 : index
    %c0_23 = arith.constant 0 : index
    %29 = vector.load %arg5[%c0_22, %c0_23] : memref<4x32xf32, #tpu.memory_space<vmem>>, vector<4x32xf32>
    %cst_24 = arith.constant dense<0.000000e+00> : vector<4x2xf32>
    %30 = tpu.matmul %29, %28, %cst_24 {dimension_numbers = #tpu.dot_dimension_numbers<[1], [0], [0], [1], [0, 0, 1, 1], [], []>} : vector<4x32xf32>, vector<32x2xf32>, vector<4x2xf32> -> vector<4x2xf32>
    %c0_25 = arith.constant 0 : index
    %c0_26 = arith.constant 0 : index
    %31 = vector.load %arg6[%c0_25, %c0_26] : memref<4x1xf32, #tpu.memory_space<vmem>>, vector<4x1xf32>
    %32 = vector.broadcast %31 : vector<4x1xf32> to vector<4x2xf32>
    %33 = arith.addf %30, %32 : vector<4x2xf32>
    %34 = arith.negf %33 : vector<4x2xf32>
    %35 = math.exp %34 : vector<4x2xf32>
    %cst_27 = arith.constant 1.000000e+00 : f32
    %36 = vector.broadcast %cst_27 : f32 to vector<4x2xf32>
    %37 = arith.addf %36, %35 : vector<4x2xf32>
    %38 = arith.divf %36, %37 : vector<4x2xf32>
    %c0_28 = arith.constant 0 : index
    %c0_29 = arith.constant 0 : index
    %39 = vector.load %arg9[%c0_28, %c0_29] : memref<4x2xf32, #tpu.memory_space<vmem>>, vector<4x2xf32>
    tpu.vector_store %arg9[%c0_28, %c0_29], %38 {strides = array<i32>} : memref<4x2xf32, #tpu.memory_space<vmem>>, vector<4x2xf32>,
    %c0_30 = arith.constant 0 : index
    %c0_31 = arith.constant 0 : index
    %40 = vector.load %arg9[%c0_30, %c0_31] : memref<4x2xf32, #tpu.memory_space<vmem>>, vector<4x1xf32>
    %c0_32 = arith.constant 0 : index
    %c0_33 = arith.constant 0 : index
    %41 = vector.load %arg1[%c0_32, %c0_33] : memref<8x256xf32, #tpu.memory_space<vmem>>, vector<4x256xf32>
    %42 = vector.broadcast %40 : vector<4x1xf32> to vector<4x256xf32>
    %43 = arith.mulf %41, %42 : vector<4x256xf32>
    %c0_34 = arith.constant 0 : index
    %c0_35 = arith.constant 0 : index
    %44 = vector.load %arg7[%c0_34, %c0_35] : memref<8x256xf32, #tpu.memory_space<vmem>>, vector<4x256xf32>
    tpu.vector_store %arg7[%c0_34, %c0_35], %43 {strides = array<i32>} : memref<8x256xf32, #tpu.memory_space<vmem>>, vector<4x256xf32>,
    %c0_36 = arith.constant 0 : index
    %c1_37 = arith.constant 1 : index
    %45 = vector.load %arg9[%c0_36, %c1_37] : memref<4x2xf32, #tpu.memory_space<vmem>>, vector<4x1xf32>
    %c4_38 = arith.constant 4 : index
    %c0_39 = arith.constant 0 : index
    %46 = vector.load %arg1[%c4_38, %c0_39] : memref<8x256xf32, #tpu.memory_space<vmem>>, vector<4x256xf32>
    %47 = vector.broadcast %45 : vector<4x1xf32> to vector<4x256xf32>
    %48 = arith.mulf %46, %47 : vector<4x256xf32>
    %c4_40 = arith.constant 4 : index
    %c0_41 = arith.constant 0 : index
    %49 = vector.load %arg7[%c4_40, %c0_41] : memref<8x256xf32, #tpu.memory_space<vmem>>, vector<4x256xf32>
    tpu.vector_store %arg7[%c4_40, %c0_41], %48 {strides = array<i32>} : memref<8x256xf32, #tpu.memory_space<vmem>>, vector<4x256xf32>,
    return
  }
  func.func @transform_0(%arg0: i32) -> (i32, i32) {
    %c0_i32 = arith.constant 0 : i32
    %c0_i32_0 = arith.constant 0 : i32
    return %arg0, %c0_i32 : i32, i32
  }
  func.func @transform_1(%arg0: i32) -> (i32, i32) {
    %c0_i32 = arith.constant 0 : i32
    %c0_i32_0 = arith.constant 0 : i32
    %c0_i32_1 = arith.constant 0 : i32
    return %c0_i32, %c0_i32_0 : i32, i32
  }
  func.func @transform_2(%arg0: i32) -> (i32, i32) {
    %c0_i32 = arith.constant 0 : i32
    %c0_i32_0 = arith.constant 0 : i32
    %c0_i32_1 = arith.constant 0 : i32
    return %c0_i32, %c0_i32_0 : i32, i32
  }
  func.func @transform_3(%arg0: i32) -> (i32, i32) {
    %c0_i32 = arith.constant 0 : i32
    %c0_i32_0 = arith.constant 0 : i32
    %c0_i32_1 = arith.constant 0 : i32
    return %c0_i32, %c0_i32_0 : i32, i32
  }
  func.func @transform_4(%arg0: i32) -> (i32, i32) {
    %c0_i32 = arith.constant 0 : i32
    %c0_i32_0 = arith.constant 0 : i32
    %c0_i32_1 = arith.constant 0 : i32
    return %c0_i32, %c0_i32_0 : i32, i32
  }
  func.func @transform_5(%arg0: i32) -> (i32, i32) {
    %c0_i32 = arith.constant 0 : i32
    %c0_i32_0 = arith.constant 0 : i32
    %c0_i32_1 = arith.constant 0 : i32
    return %c0_i32, %c0_i32_0 : i32, i32
  }
  func.func @transform_6(%arg0: i32) -> (i32, i32) {
    %c0_i32 = arith.constant 0 : i32
    %c0_i32_0 = arith.constant 0 : i32
    return %arg0, %c0_i32 : i32, i32
  }
}

</mosaic_0001>

<bundles_post_ra>
// kernel: tpu_custom_call.1
= control target key start
LH: loop header
LB: loop body
LE: loop exit
PB: predicated region body
PF: predicated region fallthrough
CT: control target
= control target key end

     0   :  { %vm27_vm0 = vcmask 1043456   ;;  %vm42_vm1 = vcmask 1047556   ;;  %s398_s7 = smov 1   ;;  %s509_s0 = inlined_call_operand.vmem [shape: f32[8,256], index: 0, kind: input, shape index: {}]   ;;  %s510_s1 = inlined_call_operand.vmem [shape: f32[2,1], index: 1, kind: input, shape index: {}]   ;;  %s511_s2 = inlined_call_operand.vmem [shape: f32[32,5], index: 2, kind: input, shape index: {}]   ;;  %s512_s3 = inlined_call_operand.vmem [shape: f32[32,1], index: 3, kind: input, shape index: {}]   ;;  %s513_s4 = inlined_call_operand.vmem [shape: f32[4,32], index: 4, kind: input, shape index: {}]   ;;  %s514_s5 = inlined_call_operand.vmem [shape: f32[4,1], index: 5, kind: input, shape index: {}]   ;;  %s515_s6 = inlined_call_operand.hbm [shape: f32[8,256], index: 6, kind: output, shape index: {}]  }
   0x1   :  { %v25_v0 = vld [vmem:[%s509_s0] sm:$0xf]  ;;  %v26_v1 = vld [vmem:[%s509_s0 + $0x8] sm:$0xf]  ;;  %v40_v4 = vld [vmem:[%s509_s0] sm:$0xf0] }
   0x2   :  { %v28_v2 = vsel %vm27_vm0, %v25_v0, 0.0  ;;  %v29_v3 = vsel %vm27_vm0, %v26_v1, 0.0  ;;  %v41_v5 = vld [vmem:[%s509_s0 + $0x8] sm:$0xf0]  ;;  %v43_v7 = vsel %vm42_vm1, %v40_v4, 0.0 }
   0x3   :  { %v30_v6 = vadd.f32 %v29_v3, %v28_v2  ;;  %v44_v8 = vsel %vm42_vm1, %v41_v5, 0.0  ;;  %v324_v9 = vld [vmem:[%s510_s1 + $0x1] sm:$0x1] }
   0x4   :  { %55 = vrot.lane.b32.xlu1 %v324_v9, %s398_s7 }
   0x5   :  { %11 = vsyncpa [#allocation5], 0  ;;  %31 = vadd.xlane.f32.xlu0 %v30_v6  ;;  %v45_v10 = vadd.f32 %v44_v8, %v43_v7  ;;  %v37_v11 = vld [vmem:[%s510_s1] sm:$0x1]  ;;  %vm38_vm2 = vcmask 0   ;;  %vm89_vm3 = vcmask 39936  }
   0x6   :  { %39 = vst.msk [vmem:[#allocation2 + $0x4] sm:$0x1] %vm38_vm2, %v37_v11  ;;  %v61_v12 = vld [vmem:[%s511_s2] sm:$0xff]  ;;  %v68_v13 = vld [vmem:[%s512_s3 + $0x18] sm:$0xff]  ;;  %v399_v14 = vmov 0   ;;  %v67_v15 = vld [vmem:[%s512_s3 + $0x10] sm:$0xff] }
   0x7   :  { %344 = vmatprep.mubr.msk.f32.mxu0 %vm89_vm3, %v61_v12  ;;  %367 = vset.pattern.permute.xlu1 %v399_v14  ;;  %v66_v16 = vld [vmem:[%s512_s3 + $0x8] sm:$0xff]  ;;  %v65_v17 = vld [vmem:[%s512_s3] sm:$0xff]  ;;  %vm58_vm4 = vcmask 8200   ;;  %vm34_vm5 = vcmask 3072   ;;  %vm49_vm6 = vcmask 15372   ;;  %vm102_vm7 = vcmask 1044480  }
   0x8   :  { %368 = vset.pattern.permute.xlu0 %v399_v14  ;;  %86 = vperm.xlu1 %367, %v68_v13   ;;  %v196_v18 = vld [vmem:[%s514_s5] sm:$0xf]  ;;  %v62_v25 = vld [vmem:[%s511_s2 + $0x8] sm:$0xff]  ;;  %v63_v26 = vld [vmem:[%s511_s2 + $0x10] sm:$0xff]  ;;  %v400_v28 = vmov 0.0   ;;  %vm401_vm8 = vmmov 0  }
   0x9   :  { %46 = vadd.xlane.f32.xlu0 %v45_v10  ;;  %v64_v27 = vld [vmem:[%s511_s2 + $0x18] sm:$0xff]  ;;  %350 = vmatprep.subr.mxu1 %v400_v28  ;;  %v195_v45 = vld [vmem:[%s513_s4] sm:$0xf]  ;;  %vm202_vm9 = vcmask 261120   ;;  %v402_v46 = vmov 1   ;;  %vm282_vm10 = vcmask 11264  }
   0xa   :  { %358 = vmatprep.mubr.msk.f32.mxu1 %vm401_vm8, %v400_v28  ;;  %v297_v57 = vld [vmem:[%s509_s0] sm:$0xf0]  ;;  %v298_v58 = vld [vmem:[%s509_s0 + $0x8] sm:$0xf0]  ;;  %v285_v63 = vld [vmem:[%s509_s0] sm:$0xf] }
   0xb   :  { %v286_v0 = vld [vmem:[%s509_s0 + $0x8] sm:$0xf]  ;;  %s403_s9 = smov [#allocation4]  }
   0xc   :  { %76 = vperm.xlu1 %367, %v66_v16   ;;  %s315_s10 = sshll.u32 %s403_s9, 4  ;;  %s316_s10 = int_to_ptr.vmem [resolvable:$true] %s315_s10 }
   0xd   :  { %s376_s11 = scalar_lea.vmem %s316_s10, 256  ;;  %p381_p1 = scmp.lt.s32.totalorder %s316_s10, %s316_s10 }
   0xe   :  { %p377_p0 = scmp.ne.s32.totalorder %s316_s10, %s376_s11  ;;  %p382_p2 = scmp.lt.s32.totalorder %s376_s11, %s376_s11 }
  0x10   :  { %71 = vperm.xlu1 %367, %v65_v17   ;;  %p383_p3 = por %p382_p2, %p381_p1 }
  0x12   :  { %p384_p4 = pnand %p383_p3, %p377_p0 }
  0x14   :  { %199 = vperm.xlu1 %367, %v196_v18  }
  0x18   :  { %369 = vset.pattern.permute.xlu1 %v402_v46 }
  0x1f   :  { %81 = vperm.xlu0 %368, %v67_v15  }
  0x23   :  { %371 = vset.pattern.permute.xlu0 %v402_v46 }
  0x76   :  { %v56_v19 = vpop.permute.xlu1 %55 }
  0x77   :  { %59 = vst.msk [vmem:[#allocation2 + $0x4] sm:$0x1] %vm58_vm4, %v56_v19 }
  0x83   :  { %v87_v29 = vpop.permute.xlu1 %86 }
  0x87   :  { %v77_v31 = vpop.permute.xlu1 %76 }
  0x8b   :  { %v72_v40 = vpop.permute.xlu1 %71 }
  0x8e   :  { %v32_v20 = vpop.xlane.xlu0 %31 }
  0x8f   :  { %v33_v21 = vmul.f32 0.00390625, %v32_v20  ;;  %v200_v47 = vpop.permute.xlu1 %199 }
  0x91   :  { %35 = vst.msk [vmem:[#allocation2] sm:$0xf] %vm34_vm5, %v33_v21 }
  0x92   :  { %v47_v22 = vpop.xlane.xlu0 %46 }
  0x93   :  { %v48_v23 = vmul.f32 0.00390625, %v47_v22 }
  0x95   :  { %50 = vst.msk [vmem:[#allocation2 - $0x4] sm:$0xf0] %vm49_vm6, %v48_v23 }
  0x9a   :  { %v82_v34 = vpop.permute.xlu0 %81 }
  0x9c   :  { %v60_v24 = vld [vmem:[#allocation2] sm:$0x1f] }
  0x9d   :  { %342 = vmatprep.subr.msk.mxu0 %vm102_vm7, %v60_v24 }
  0x9e   :  { %343 = vmatpush3.msk.msra.mxu0 %vm102_vm7, %v60_v24 }
  0x9f   :  { %345 = vmatmul.mubr.msk.f32.vlgmr.msra.gmra.mxu0 %vm89_vm3, %v62_v25 }
  0xa0   :  { %347 = vmatprep.mubr.msk.f32.mxu0 %vm89_vm3, %v63_v26 }
  0xa3   :  { %348 = vmatmul.mubr.msk.f32.gmra.mxu0 %vm89_vm3, %v64_v27 }
 0x15f   :  { %v346_v30 = vpop.f32.mrf.mxu0 }
 0x160   :  { %v178_v37 = vadd.f32 %v346_v30, %v77_v31 }
 0x161   :  { %v172_v32 = vpop.f32.mrf.mxu0 }
 0x162   :  { %v173_v41 = vadd.f32 %v172_v32, %v72_v40  ;;  %v192_v43 = vmax.f32 %v178_v37, 0.0 }
 0x163   :  { %v349_v33 = vpop.f32.mrf.mxu0 }
 0x164   :  { %v188_v35 = vadd.f32 %v349_v33, %v87_v29  ;;  %v191_v44 = vmax.f32 %v173_v41, 0.0 }
 0x165   :  { %v182_v36 = vpop.f32.mrf.mxu0 }
 0x166   :  { %v194_v38 = vmax.f32 %v188_v35, 0.0  ;;  %v183_v39 = vadd.f32 %v182_v36, %v82_v34 }
 0x168   :  { %v193_v42 = vmax.f32 %v183_v39, 0.0  ;;  %351 = vmatpush3.msra.mxu1 %v194_v38 }
 0x169   :  { %352 = vmatprep.subr.mxu1 %v400_v28 }
 0x16a   :  { %353 = vmatpush3.msra.mxu1 %v193_v42 }
 0x16b   :  { %354 = vmatprep.subr.mxu1 %v400_v28 }
 0x16c   :  { %355 = vmatpush3.msra.mxu1 %v192_v43 }
 0x16d   :  { %356 = vmatprep.subr.mxu1 %v400_v28 }
 0x16e   :  { %357 = vmatpush3.msra.mxu1 %v191_v44 }
 0x16f   :  { %359 = vmatmul.mubr.msk.f32.vlgmr.msra.gmra.mxu1 %vm202_vm9, %v195_v45 }
 0x22f   :  { %v272_v48 = vpop.f32.mrf.mxu1 }
 0x230   :  { %v273_v49 = vadd.f32 %v272_v48, %v200_v47 }
 0x231   :  { %v360_v50 = vpop.f32.mrf.mxu1 }
 0x232   :  { %v331_v51 = vmul.f32 -1.442695, %v273_v49 }
 0x234   :  { %372 = vpow2.f32 %v331_v51 }
 0x241   :  { %v373_v52 = vpop.eup %372 }
 0x242   :  { %v279_v53 = vadd.f32 1.0, %v373_v52 }
 0x244   :  { %374 = vrcp.f32 %v279_v53 }
 0x251   :  { %v375_v54 = vpop.eup %374 }
 0x252   :  { %283 = vst.msk [vmem:[#allocation3] sm:$0xf] %vm282_vm10, %v375_v54 }
 0x259   :  { %v296_v55 = vld [vmem:[#allocation3] sm:$0xf] }
 0x25a   :  { %301 = vperm.xlu1 %369, %v296_v55   ;;  %v284_v56 = vld [vmem:[#allocation3] sm:$0xf] }
 0x25e   :  { %370 = vset.pattern.permute.xlu1 %v399_v14 }
 0x25f   :  { %289 = vperm.xlu1 %370, %v284_v56  }
 0x2d5   :  { %v302_v59 = vpop.permute.xlu1 %301 }
 0x2d6   :  { %v303_v60 = vrot.slane %v302_v59, 4 }
 0x2d8   :  { %v305_v61 = vmul.f32 %v303_v60, %v297_v57  ;;  %v306_v62 = vmul.f32 %v303_v60, %v298_v58 }
 0x2da   :  { %307 = vst [vmem:[#allocation4] sm:$0xf0] %v305_v61  ;;  %308 = vst [vmem:[#allocation4 + $0x8] sm:$0xf0] %v306_v62  ;;  %v290_v1 = vpop.permute.xlu1 %289 }
 0x2db   :  { %v292_v2 = vmul.f32 %v290_v1, %v285_v63  ;;  %v293_v3 = vmul.f32 %v290_v1, %v286_v0 }
 0x2dd   :  { %294 = vst [vmem:[#allocation4] sm:$0xf] %v292_v2  ;;  %295 = vst [vmem:[#allocation4 + $0x8] sm:$0xf] %v293_v3 }
 0x2de   :  { %387 = shalt.err (!%p384_p4)
}
 0x2df   :  { %318 = dma.vmem_to_hbm [thread:$0]  %s316_s10, 256, %s515_s6, [#allocation5]  }
 0x2e0   :  { %396 = dma.done.wait [#allocation5], 256  }
 0x2e1   :  { %397 = vsyncadd [#allocation5], 4294967040 }
 0x2e2   :  { %322 = vsyncpa [#allocation5], 1 }

</bundles_post_ra>
